<compile_context>
chip_gen: v7x
topology: tpu7x:2x2x1
jax: 0.10.0
libtpu: 0.0.40
codegen_flags: <defaults>
</compile_context>

<pallas_src>
import jax
import jax.numpy as jnp
from jax.experimental import pallas as pl
from jax.experimental.pallas import tpu as pltpu


def _critic_kernel(x_ref, w1t_ref, w2t_ref, w3c_ref, b3_ref, o_ref):
    x = x_ref[...]                                   # (Din, TB) f32, batch on lanes
    w1t = w1t_ref[...]                               # (H, Din) f32, read once
    din = x.shape[0]

    # ---- Layer 1: K = Din (tiny) -> f32 VPU broadcast FMAs, no MXU push. ----
    h1 = w1t[:, 0:1] * x[0:1, :]                     # (H,1)*(1,TB) -> (H, TB)
    for k in range(1, din):
        h1 = h1 + w1t[:, k:k + 1] * x[k:k + 1, :]
    h1 = jnp.maximum(h1, 0.0)                        # ReLU (Dropout = identity)

    # ---- Layer 2: (H,H) @ (H,TB) on the MXU; bf16 operands, f32 accumulate. ----
    h2 = jnp.dot(w2t_ref[...], h1.astype(jnp.bfloat16),
                 preferred_element_type=jnp.float32)  # (H, TB) f32
    h2 = jnp.maximum(h2, 0.0)                        # ReLU (Dropout = identity)

    # ---- Layer 3: 64 -> 1 as an f32 multiply + sublane reduce (VPU/XLU), ----
    # ---- keeping the MXU for layer 2; (1, TB) -> lane-dense store. ----------
    y = jnp.sum(h2 * w3c_ref[...], axis=0, keepdims=True)    # (1, TB) f32
    o_ref[...] = (y + b3_ref[0]).astype(o_ref.dtype)


def _round_up(x, m):
    return (x + m - 1) // m * m


def critic_forward_packed(x_t, w1t, w2t, w3c, b3, *, tile_b=8192):
    """x_t: feature-major (Ds+Da, B) f32 slab (batch on the lane axis)."""
    din, B = x_t.shape
    H = w1t.shape[0]

    # Lane-dense batch tile (multiple of 128); capped so the grid has >= 2 steps
    # whenever B > 128 (keeps both v7x TensorCores busy), and by tile_b.
    tb = _round_up(min(tile_b, _round_up(pl.cdiv(B, 2), 128)), 128)
    grid = (pl.cdiv(B, tb),)

    out = pl.pallas_call(
        _critic_kernel,
        out_shape=jax.ShapeDtypeStruct((1, B), jnp.float32),
        grid=grid,
        in_specs=[
            pl.BlockSpec((din, tb), lambda i: (0, i)),          # x slab tile
            pl.BlockSpec((H, din), lambda i: (0, 0)),           # W1^T   (resident, f32)
            pl.BlockSpec((H, H), lambda i: (0, 0)),             # W2^T   (resident, bf16)
            pl.BlockSpec((H, 1), lambda i: (0, 0)),             # W3 col (resident, f32)
            pl.BlockSpec(memory_space=pltpu.MemorySpace.SMEM),  # b3 scalar
        ],
        out_specs=pl.BlockSpec((1, tb), lambda i: (0, i)),      # lane-dense output
        compiler_params=pltpu.CompilerParams(
            dimension_semantics=("parallel",),
            vmem_limit_bytes=32 * 1024 * 1024,
        ),
    )(x_t, w1t, w2t, w3c, b3)
    return out.reshape(B, 1)


def critic_forward(state, action, w1, w2, w3, b3, *, tile_b=8192):
    """state: (B, Ds), action: (B, Da) with Ds + Da == w1.shape[0].

    Packs inputs feature-major (one small relayout pass). Producers that can
    supply the (Ds+Da, B) slab directly should call critic_forward_packed and
    pay no relayout at all.
    """
    x_t = jnp.concatenate([state, action], axis=-1).astype(jnp.float32).T  # (Din, B)
    w1t = w1.T.astype(jnp.float32)                 # (H, Din)
    w2t = w2.T.astype(jnp.bfloat16)                # (H, H)   MXU operand
    w3c = w3.reshape(-1, 1).astype(jnp.float32)    # (H, 1)
    b3v = b3.reshape(1).astype(jnp.float32)        # (1,)
    return critic_forward_packed(x_t, w1t, w2t, w3c, b3v, tile_b=tile_b)


def init_params(key, input_size=4, hidden=64):
    k1, k2, k3, k4 = jax.random.split(key, 4)
    # linear1: Linear(4, 64, bias=False)  -> stored as (in, out)
    bound1 = 1.0 / jnp.sqrt(input_size)
    w1 = jax.random.uniform(k1, (input_size, hidden), jnp.float32, -bound1, bound1)
    # linear2: Linear(64, 64, bias=False)
    bound2 = 1.0 / jnp.sqrt(hidden)
    w2 = jax.random.uniform(k2, (hidden, hidden), jnp.float32, -bound2, bound2)
    # classifier: Linear(64, 1); weight overridden to uniform(-0.003, 0.003)
    w3 = jax.random.uniform(k3, (hidden, 1), jnp.float32, -0.003, 0.003)
    b3 = jax.random.uniform(k4, (1,), jnp.float32, -bound2, bound2)
    return w1, w2, w3, b3


def reference_forward(state, action, w1, w2, w3, b3):
    x = jnp.concatenate([state, action], axis=-1).astype(jnp.float32)
    h1 = jnp.maximum(x @ w1, 0.0)
    h2 = jnp.maximum(h1 @ w2, 0.0)
    return h2 @ w3 + b3


if __name__ == "__main__":
    key = jax.random.PRNGKey(0)
    kp, ks, ka, ks2, ka2 = jax.random.split(key, 5)

    w1, w2, w3, b3 = init_params(kp)

    # Canonical small shapes: batch=2, state=3, action=1 (concat -> 4 features).
    B, Ds, Da = 2, 3, 1
    state = jax.random.normal(ks, (B, Ds), jnp.float32)
    action = jax.random.normal(ka, (B, Da), jnp.float32)
    out = jax.block_until_ready(critic_forward(state, action, w1, w2, w3, b3))
    ref = reference_forward(state, action, w1, w2, w3, b3)
    assert out.shape == (B, 1), out.shape
    # bf16 MXU operands (f32 accumulate) -> relaxed tolerance vs f32 reference.
    assert jnp.allclose(out, ref, atol=1e-2, rtol=5e-2), (out, ref)

    # Ragged batch: exercises >=2 grid steps and the masked partial last block.
    B2 = 300
    state2 = jax.random.normal(ks2, (B2, Ds), jnp.float32)
    action2 = jax.random.normal(ka2, (B2, Da), jnp.float32)
    out2 = jax.block_until_ready(critic_forward(state2, action2, w1, w2, w3, b3))
    ref2 = reference_forward(state2, action2, w1, w2, w3, b3)
    assert out2.shape == (B2, 1), out2.shape
    assert jnp.allclose(out2, ref2, atol=1e-2, rtol=5e-2), (
        float(jnp.max(jnp.abs(out2 - ref2))),)

    print("KERNEL_OK")
</pallas_src>

<mosaic_0001>
module attributes {stable_mosaic.version = 11 : i64} {
  func.func @_critic_kernel(%arg0: i32, %arg1: memref<4x128xf32, #tpu.memory_space<vmem>>, %arg2: memref<64x4xf32, #tpu.memory_space<vmem>>, %arg3: memref<64x64xbf16, #tpu.memory_space<vmem>>, %arg4: memref<64x1xf32, #tpu.memory_space<vmem>>, %arg5: memref<1xf32, #tpu.memory_space<smem>>, %arg6: memref<1x128xf32, #tpu.memory_space<vmem>>) attributes {dimension_semantics = [#tpu.dimension_semantics<parallel>], iteration_bounds = array<i64: 1>, scalar_prefetch = 0 : i64, scratch_operands = 0 : i64, tpu.core_type = #tpu.core_type<tc>, window_params = [{transform_indices = @transform_0, window_bounds = array<i64: 4, 128>}, {pipeline_mode = #tpu.pipeline_mode<synchronous>, transform_indices = @transform_1, window_bounds = array<i64: 64, 4>}, {pipeline_mode = #tpu.pipeline_mode<synchronous>, transform_indices = @transform_2, window_bounds = array<i64: 64, 64>}, {pipeline_mode = #tpu.pipeline_mode<synchronous>, transform_indices = @transform_3, window_bounds = array<i64: 64, 1>}, {transform_indices = @transform_4, window_bounds = array<i64: 1>}, {transform_indices = @transform_5, window_bounds = array<i64: 1, 128>}]} {
    %c0 = arith.constant 0 : index
    %c0_0 = arith.constant 0 : index
    %0 = vector.load %arg1[%c0, %c0_0] : memref<4x128xf32, #tpu.memory_space<vmem>>, vector<4x128xf32>
    %c0_1 = arith.constant 0 : index
    %c0_2 = arith.constant 0 : index
    %1 = vector.load %arg2[%c0_1, %c0_2] : memref<64x4xf32, #tpu.memory_space<vmem>>, vector<64x4xf32>
    %2 = vector.extract_strided_slice %1 {offsets = [0, 0], sizes = [64, 1], strides = [1, 1]} : vector<64x4xf32> to vector<64x1xf32>
    %3 = vector.extract_strided_slice %0 {offsets = [0, 0], sizes = [1, 128], strides = [1, 1]} : vector<4x128xf32> to vector<1x128xf32>
    %4 = vector.broadcast %2 : vector<64x1xf32> to vector<64x128xf32>
    %5 = vector.broadcast %3 : vector<1x128xf32> to vector<64x128xf32>
    %6 = arith.mulf %4, %5 : vector<64x128xf32>
    %7 = vector.extract_strided_slice %1 {offsets = [0, 1], sizes = [64, 1], strides = [1, 1]} : vector<64x4xf32> to vector<64x1xf32>
    %8 = vector.extract_strided_slice %0 {offsets = [1, 0], sizes = [1, 128], strides = [1, 1]} : vector<4x128xf32> to vector<1x128xf32>
    %9 = vector.broadcast %7 : vector<64x1xf32> to vector<64x128xf32>
    %10 = vector.broadcast %8 : vector<1x128xf32> to vector<64x128xf32>
    %11 = arith.mulf %9, %10 : vector<64x128xf32>
    %12 = arith.addf %6, %11 : vector<64x128xf32>
    %13 = vector.extract_strided_slice %1 {offsets = [0, 2], sizes = [64, 1], strides = [1, 1]} : vector<64x4xf32> to vector<64x1xf32>
    %14 = vector.extract_strided_slice %0 {offsets = [2, 0], sizes = [1, 128], strides = [1, 1]} : vector<4x128xf32> to vector<1x128xf32>
    %15 = vector.broadcast %13 : vector<64x1xf32> to vector<64x128xf32>
    %16 = vector.broadcast %14 : vector<1x128xf32> to vector<64x128xf32>
    %17 = arith.mulf %15, %16 : vector<64x128xf32>
    %18 = arith.addf %12, %17 : vector<64x128xf32>
    %19 = vector.extract_strided_slice %1 {offsets = [0, 3], sizes = [64, 1], strides = [1, 1]} : vector<64x4xf32> to vector<64x1xf32>
    %20 = vector.extract_strided_slice %0 {offsets = [3, 0], sizes = [1, 128], strides = [1, 1]} : vector<4x128xf32> to vector<1x128xf32>
    %21 = vector.broadcast %19 : vector<64x1xf32> to vector<64x128xf32>
    %22 = vector.broadcast %20 : vector<1x128xf32> to vector<64x128xf32>
    %23 = arith.mulf %21, %22 : vector<64x128xf32>
    %24 = arith.addf %18, %23 : vector<64x128xf32>
    %cst = arith.constant 0.000000e+00 : f32
    %25 = vector.broadcast %cst : f32 to vector<64x128xf32>
    %26 = arith.maximumf %24, %25 : vector<64x128xf32>
    %c0_3 = arith.constant 0 : index
    %c0_4 = arith.constant 0 : index
    %27 = vector.load %arg3[%c0_3, %c0_4] : memref<64x64xbf16, #tpu.memory_space<vmem>>, vector<64x64xbf16>
    %28 = arith.truncf %26 : vector<64x128xf32> to vector<64x128xbf16>
    %cst_5 = arith.constant dense<0.000000e+00> : vector<64x128xf32>
    %29 = tpu.matmul %27, %28, %cst_5 {dimension_numbers = #tpu.dot_dimension_numbers<[1], [0], [0], [1], [0, 0, 1, 1], [], []>} : vector<64x64xbf16>, vector<64x128xbf16>, vector<64x128xf32> -> vector<64x128xf32>
    %cst_6 = arith.constant 0.000000e+00 : f32
    %30 = vector.broadcast %cst_6 : f32 to vector<64x128xf32>
    %31 = arith.maximumf %29, %30 : vector<64x128xf32>
    %c0_7 = arith.constant 0 : index
    %c0_8 = arith.constant 0 : index
    %32 = vector.load %arg4[%c0_7, %c0_8] : memref<64x1xf32, #tpu.memory_space<vmem>>, vector<64x1xf32>
    %33 = vector.broadcast %32 : vector<64x1xf32> to vector<64x128xf32>
    %34 = arith.mulf %31, %33 : vector<64x128xf32>
    %cst_9 = arith.constant dense<0.000000e+00> : vector<128xf32>
    %35 = vector.multi_reduction <add>, %34, %cst_9 [0] : vector<64x128xf32> to vector<128xf32>
    %36 = vector.shape_cast %35 : vector<128xf32> to vector<1x128xf32>
    %c0_10 = arith.constant 0 : index
    %37 = memref.load %arg5[%c0_10] : memref<1xf32, #tpu.memory_space<smem>>
    %38 = vector.broadcast %37 : f32 to vector<1x128xf32>
    %39 = arith.addf %36, %38 : vector<1x128xf32>
    %c0_11 = arith.constant 0 : index
    %c0_12 = arith.constant 0 : index
    %40 = vector.load %arg6[%c0_11, %c0_12] : memref<1x128xf32, #tpu.memory_space<vmem>>, vector<1x128xf32>
    tpu.vector_store %arg6[%c0_11, %c0_12], %39 {strides = array<i32>} : memref<1x128xf32, #tpu.memory_space<vmem>>, vector<1x128xf32>,
    return
  }
  func.func @transform_0(%arg0: i32) -> (i32, i32) {
    %c0_i32 = arith.constant 0 : i32
    %c0_i32_0 = arith.constant 0 : i32
    return %c0_i32, %arg0 : i32, i32
  }
  func.func @transform_1(%arg0: i32) -> (i32, i32) {
    %c0_i32 = arith.constant 0 : i32
    %c0_i32_0 = arith.constant 0 : i32
    %c0_i32_1 = arith.constant 0 : i32
    return %c0_i32, %c0_i32_0 : i32, i32
  }
  func.func @transform_2(%arg0: i32) -> (i32, i32) {
    %c0_i32 = arith.constant 0 : i32
    %c0_i32_0 = arith.constant 0 : i32
    %c0_i32_1 = arith.constant 0 : i32
    return %c0_i32, %c0_i32_0 : i32, i32
  }
  func.func @transform_3(%arg0: i32) -> (i32, i32) {
    %c0_i32 = arith.constant 0 : i32
    %c0_i32_0 = arith.constant 0 : i32
    %c0_i32_1 = arith.constant 0 : i32
    return %c0_i32, %c0_i32_0 : i32, i32
  }
  func.func @transform_4(%arg0: i32) -> i32 {
    %c0_i32 = arith.constant 0 : i32
    %c0_i32_0 = arith.constant 0 : i32
    return %c0_i32 : i32
  }
  func.func @transform_5(%arg0: i32) -> (i32, i32) {
    %c0_i32 = arith.constant 0 : i32
    %c0_i32_0 = arith.constant 0 : i32
    return %c0_i32, %arg0 : i32, i32
  }
}

</mosaic_0001>

<bundles_post_ra>
// kernel: tpu_custom_call.1
= control target key start
LH: loop header
LB: loop body
LE: loop exit
PB: predicated region body
PF: predicated region fallthrough
CT: control target
= control target key end

     0   :  { %v548_v1 = vmov 3   ;;  %v549_v2 = vmov 1   ;;  %s711_s0 = inlined_call_operand.vmem [shape: f32[4,2], index: 0, kind: input, shape index: {}]   ;;  %s712_s1 = inlined_call_operand.vmem [shape: f32[64,4], index: 1, kind: input, shape index: {}]   ;;  %s713_s2 = inlined_call_operand.vmem [shape: bf16[64,64], index: 2, kind: input, shape index: {}]   ;;  %s714_s3 = inlined_call_operand.vmem [shape: f32[64,1], index: 3, kind: input, shape index: {}]   ;;  %s715_s4 = inlined_call_operand.<no memory space> [shape: f32[1], index: 4, kind: input, shape index: {}]   ;;  %s716_s5 = inlined_call_operand.hbm [shape: f32[1,2], index: 5, kind: output, shape index: {}]  }
   0x1   :  { %v24_v0 = vld [vmem:[%s712_s1] sm:$0xff]  ;;  %502 = vset.pattern.permute.xlu0 %v548_v1  ;;  %498 = vset.pattern.permute.xlu1 %v549_v2  ;;  %v27_v3 = vld [vmem:[%s712_s1 + $0x18] sm:$0xff]  ;;  %v25_v4 = vld [vmem:[%s712_s1 + $0x8] sm:$0xff] }
   0x2   :  { %189 = vperm.xlu0 %502, %v24_v0   ;;  %85 = vperm.xlu1 %498, %v24_v0  }
   0x6   :  { %201 = vperm.xlu0 %502, %v27_v3   ;;  %89 = vperm.xlu1 %498, %v25_v4  }
   0x7   :  { %11 = vsyncpa [#allocation4], 0  ;;  %v550_v5 = vmov 0   ;;  %v551_v6 = vmov 2   ;;  %v26_v7 = vld [vmem:[%s712_s1 + $0x10] sm:$0xff]  ;;  %v28_v9 = vld [vmem:[%s712_s1 + $0x20] sm:$0xff]  ;;  %v72_v30 = vlaneseq }
   0x8   :  { %v30_v8 = vld [vmem:[%s712_s1 + $0x30] sm:$0xff]  ;;  %v31_v10 = vld [vmem:[%s712_s1 + $0x38] sm:$0xff]  ;;  %v29_v11 = vld [vmem:[%s712_s1 + $0x28] sm:$0xff]  ;;  %vm280_vm0 = vcmask 523264   ;;  %s552_s8 = smov [#allocation3]  }
   0x9   :  { %v520_v12 = vld [vmem:[%s713_s2] sm:$0xff]   ;;  %v521_v13 = vld [vmem:[%s713_s2 + $0x10] sm:$0xff]   ;;  %v367_v16 = vld [vmem:[%s714_s3 + $0x8] sm:$0xff]  ;;  %v73_v33 = vshrl.u32 %v72_v30, 7  ;;  %s445_s1 = sshll.u32 %s552_s8, 4  ;;  %s446_s1 = int_to_ptr.vmem [resolvable:$true] %s445_s1 }
   0xa   :  { %508 = vset.pattern.permute.xlu0 %v550_v5  ;;  %499 = vset.pattern.permute.xlu1 %v551_v6  ;;  %v366_v14 = vld [vmem:[%s714_s3] sm:$0xff]  ;;  %v368_v15 = vld [vmem:[%s714_s3 + $0x10] sm:$0xff]  ;;  %v371_v17 = vld [vmem:[%s714_s3 + $0x28] sm:$0xff]  ;;  %s524_s9 = scalar_lea.vmem %s446_s1, 16  ;;  %s528_s10 = scalar_lea.vmem %s446_s1, 32 }
   0xb   :  { %34 = vperm.xlu0 %508, %v24_v0   ;;  %141 = vperm.xlu1 %499, %v25_v4   ;;  %v369_v18 = vld [vmem:[%s714_s3 + $0x18] sm:$0xff]  ;;  %v370_v20 = vld [vmem:[%s714_s3 + $0x20] sm:$0xff]  ;;  %v372_v21 = vld [vmem:[%s714_s3 + $0x30] sm:$0xff]  ;;  %v74_v35 = vsub.s32 0, %v73_v33  ;;  %v118_v37 = vsub.s32 1, %v73_v33  ;;  %v222_v39 = vsub.s32 3, %v73_v33  ;;  %p525_p0 = scmp.ne.s32.totalorder %s446_s1, %s524_s9  ;;  %p529_p1 = scmp.lt.s32.totalorder %s446_s1, %s446_s1 }
   0xc   :  { %477 = vmatprep.mubr.msk.bf16.mxu0 %vm280_vm0, %v520_v12  ;;  %481 = vmatprep.mubr.msk.bf16.mxu1 %vm280_vm0, %v521_v13  ;;  %v373_v19 = vld [vmem:[%s714_s3 + $0x38] sm:$0xff]  ;;  %v23_v38 = vld [vmem:[%s711_s0] sm:$0xf]  ;;  %v170_v41 = vsub.s32 2, %v73_v33  ;;  %p530_p2 = scmp.lt.s32.totalorder %s528_s10, %s524_s9 }
   0xd   :  { %v644_v40 = vrot.slane %v23_v38, %v74_v35  ;;  %v646_v43 = vrot.slane %v23_v38, %v118_v37  ;;  %v649_v46 = vrot.slane %v23_v38, %v222_v39 }
   0xe   :  { %v652_v48 = vrot.slane %v23_v38, %v170_v41  ;;  %p531_p3 = por %p530_p2, %p529_p1 }
   0xf   :  { %39 = vperm.xlu0 %508, %v25_v4   ;;  %500 = vset.pattern.permute.xlu1 %v550_v5 }
  0x10   :  { %44 = vperm.xlu1 %500, %v26_v7   ;;  %p532_p4 = pnand %p531_p3, %p525_p0 }
  0x13   :  { %49 = vperm.xlu0 %508, %v27_v3  }
  0x14   :  { %501 = vset.pattern.permute.xlu1 %v549_v2 }
  0x15   :  { %93 = vperm.xlu1 %501, %v26_v7  }
  0x17   :  { %64 = vperm.xlu0 %508, %v30_v8  }
  0x19   :  { %97 = vperm.xlu1 %501, %v27_v3  }
  0x1b   :  { %510 = vset.pattern.permute.xlu0 %v549_v2 }
  0x1c   :  { %101 = vperm.xlu0 %510, %v28_v9  }
  0x1d   :  { %503 = vset.pattern.permute.xlu1 %v548_v1 }
  0x1e   :  { %193 = vperm.xlu1 %503, %v25_v4  }
  0x20   :  { %113 = vperm.xlu0 %510, %v31_v10  }
  0x22   :  { %504 = vset.pattern.permute.xlu1 %v551_v6 }
  0x23   :  { %145 = vperm.xlu1 %504, %v26_v7  }
  0x24   :  { %513 = vset.pattern.permute.xlu0 %v551_v6 }
  0x25   :  { %137 = vperm.xlu0 %513, %v24_v0  }
  0x27   :  { %505 = vset.pattern.permute.xlu1 %v550_v5 }
  0x28   :  { %54 = vperm.xlu1 %505, %v28_v9  }
  0x29   :  { %149 = vperm.xlu0 %513, %v27_v3  }
  0x2c   :  { %59 = vperm.xlu1 %505, %v29_v11  }
  0x2d   :  { %161 = vperm.xlu0 %513, %v30_v8  }
  0x30   :  { %506 = vset.pattern.permute.xlu1 %v549_v2 }
  0x31   :  { %105 = vperm.xlu1 %506, %v29_v11   ;;  %517 = vset.pattern.permute.xlu0 %v548_v1 }
  0x32   :  { %217 = vperm.xlu0 %517, %v31_v10  }
  0x35   :  { %507 = vset.pattern.permute.xlu1 %v548_v1 }
  0x36   :  { %197 = vperm.xlu1 %507, %v26_v7   ;;  %519 = vset.pattern.permute.xlu0 %v550_v5 }
  0x37   :  { %386 = vperm.xlu0 %519, %v368_v15  }
  0x3a   :  { %509 = vset.pattern.permute.xlu1 %v551_v6 }
  0x3b   :  { %153 = vperm.xlu1 %509, %v28_v9   ;;  %401 = vperm.xlu0 %519, %v371_v17  }
  0x3f   :  { %157 = vperm.xlu1 %509, %v29_v11   ;;  %411 = vperm.xlu0 %519, %v373_v19  }
  0x43   :  { %511 = vset.pattern.permute.xlu1 %v550_v5 }
  0x44   :  { %69 = vperm.xlu1 %511, %v31_v10  }
  0x48   :  { %512 = vset.pattern.permute.xlu1 %v549_v2 }
  0x49   :  { %109 = vperm.xlu1 %512, %v30_v8  }
  0x4d   :  { %514 = vset.pattern.permute.xlu1 %v548_v1 }
  0x4e   :  { %205 = vperm.xlu1 %514, %v28_v9  }
  0x52   :  { %209 = vperm.xlu1 %514, %v29_v11  }
  0x56   :  { %515 = vset.pattern.permute.xlu1 %v551_v6 }
  0x57   :  { %165 = vperm.xlu1 %515, %v31_v10  }
  0x5b   :  { %516 = vset.pattern.permute.xlu1 %v548_v1 }
  0x5c   :  { %213 = vperm.xlu1 %516, %v30_v8  }
  0x60   :  { %518 = vset.pattern.permute.xlu1 %v550_v5 }
  0x61   :  { %376 = vperm.xlu1 %518, %v366_v14  }
  0x65   :  { %381 = vperm.xlu1 %518, %v367_v16  }
  0x69   :  { %391 = vperm.xlu1 %518, %v369_v18  }
  0x6d   :  { %396 = vperm.xlu1 %518, %v370_v20  }
  0x71   :  { %406 = vperm.xlu1 %518, %v372_v21  }
  0x81   :  { %v86_v22 = vpop.permute.xlu1 %85  ;;  %v190_v23 = vpop.permute.xlu0 %189 }
  0x82   :  { %v120_v53 = vmul.f32 %v646_v43, %v86_v22  ;;  %v224_v57 = vmul.f32 %v649_v46, %v190_v23 }
  0x85   :  { %v90_v24 = vpop.permute.xlu1 %89  ;;  %v202_v25 = vpop.permute.xlu0 %201 }
  0x86   :  { %v121_v47 = vmul.f32 %v646_v43, %v90_v24  ;;  %v227_v12 = vmul.f32 %v649_v46, %v202_v25 }
  0x8a   :  { %v35_v26 = vpop.permute.xlu0 %34  ;;  %v142_v27 = vpop.permute.xlu1 %141 }
  0x8b   :  { %v76_v50 = vmul.f32 %v644_v40, %v35_v26  ;;  %v173_v54 = vmul.f32 %v652_v48, %v142_v27 }
  0x8d   :  { %v128_v58 = vadd.f32 %v120_v53, %v76_v50 }
  0x8e   :  { %v40_v28 = vpop.permute.xlu0 %39 }
  0x8f   :  { %v45_v29 = vpop.permute.xlu1 %44  ;;  %v77_v44 = vmul.f32 %v644_v40, %v40_v28 }
  0x90   :  { %v78_v13 = vmul.f32 %v644_v40, %v45_v29 }
  0x91   :  { %v129_v51 = vadd.f32 %v121_v47, %v77_v44 }
  0x92   :  { %v50_v31 = vpop.permute.xlu0 %49 }
  0x93   :  { %v181_v59 = vadd.f32 %v173_v54, %v129_v51  ;;  %v79_v5 = vmul.f32 %v644_v40, %v50_v31 }
  0x94   :  { %v94_v32 = vpop.permute.xlu1 %93 }
  0x95   :  { %v122_v9 = vmul.f32 %v646_v43, %v94_v32 }
  0x96   :  { %v639_v34 = vpop.permute.xlu0 %64 }
  0x97   :  { %v130_v16 = vadd.f32 %v122_v9, %v78_v13 }
  0x98   :  { %v98_v36 = vpop.permute.xlu1 %97 }
  0x99   :  { %v123_v6 = vmul.f32 %v646_v43, %v98_v36 }
  0x9b   :  { %v102_v42 = vpop.permute.xlu0 %101  ;;  %v131_v10 = vadd.f32 %v123_v6, %v79_v5 }
  0x9c   :  { %v124_v29 = vmul.f32 %v646_v43, %v102_v42 }
  0x9d   :  { %v194_v45 = vpop.permute.xlu1 %193 }
  0x9e   :  { %v225_v55 = vmul.f32 %v649_v46, %v194_v45 }
  0x9f   :  { %v654_v49 = vpop.permute.xlu0 %113 }
  0xa0   :  { %v233_v61 = vadd.f32 %v225_v55, %v181_v59  ;;  %v127_v51 = vmul.f32 %v646_v43, %v654_v49 }
  0xa2   :  { %v146_v52 = vpop.permute.xlu1 %145  ;;  %v241_v1 = vmax.f32 %v233_v61, 0.0 }
  0xa3   :  { %v174_v14 = vmul.f32 %v652_v48, %v146_v52 }
  0xa4   :  { %v138_v56 = vpop.permute.xlu0 %137 }
  0xa5   :  { %v172_v60 = vmul.f32 %v652_v48, %v138_v56  ;;  %v182_v18 = vadd.f32 %v174_v14, %v130_v16  ;;  %v82_v56 = vmul.f32 %v644_v40, %v639_v34 }
  0xa7   :  { %v180_v62 = vadd.f32 %v172_v60, %v128_v58  ;;  %v55_v63 = vpop.permute.xlu1 %54 }
  0xa8   :  { %v150_v3 = vpop.permute.xlu0 %149  ;;  %v80_v30 = vmul.f32 %v644_v40, %v55_v63 }
  0xa9   :  { %v232_v0 = vadd.f32 %v224_v57, %v180_v62  ;;  %v175_v8 = vmul.f32 %v652_v48, %v150_v3 }
  0xaa   :  { %v132_v35 = vadd.f32 %v124_v29, %v80_v30 }
  0xab   :  { %v240_v2 = vmax.f32 %v232_v0, 0.0  ;;  %v60_v4 = vpop.permute.xlu1 %59  ;;  %v183_v15 = vadd.f32 %v175_v8, %v131_v10 }
  0xac   :  { %v81_v36 = vmul.f32 %v644_v40, %v60_v4  ;;  %v162_v44 = vpop.permute.xlu0 %161 }
  0xad   :  { %v256_v7 = vpack.c.bf16 %v241_v1, %v240_v2  ;;  %v235_v19 = vadd.f32 %v227_v12, %v183_v15  ;;  %v178_v63 = vmul.f32 %v652_v48, %v162_v44 }
  0xaf   :  { %469 = vmatprep.subr.bf16.mxu0 %v256_v7  ;;  %485 = vmatprep.subr.bf16.mxu1 %v256_v7  ;;  %v243_v22 = vmax.f32 %v235_v19, 0.0 }
  0xb0   :  { %v106_v11 = vpop.permute.xlu1 %105  ;;  %470 = vmatpush3.bf16.msra.mxu0 %v256_v7  ;;  %489 = vmatpush3.bf16.msra.mxu1 %v256_v7  ;;  %v523_v7 = vld [vmem:[%s713_s2 + $0x18] sm:$0xff]  }
  0xb1   :  { %v125_v31 = vmul.f32 %v646_v43, %v106_v11  ;;  %v218_v55 = vpop.permute.xlu0 %217 }
  0xb2   :  { %v231_v49 = vmul.f32 %v649_v46, %v218_v55 }
  0xb3   :  { %v133_v39 = vadd.f32 %v125_v31, %v81_v36 }
  0xb5   :  { %v198_v17 = vpop.permute.xlu1 %197 }
  0xb6   :  { %v226_v20 = vmul.f32 %v649_v46, %v198_v17  ;;  %v387_v10 = vpop.permute.xlu0 %386 }
  0xb8   :  { %v234_v21 = vadd.f32 %v226_v20, %v182_v18 }
  0xba   :  { %v242_v23 = vmax.f32 %v234_v21, 0.0  ;;  %v154_v24 = vpop.permute.xlu1 %153  ;;  %v402_v29 = vpop.permute.xlu0 %401 }
  0xbb   :  { %v176_v32 = vmul.f32 %v652_v48, %v154_v24 }
  0xbc   :  { %v257_v26 = vpack.c.bf16 %v243_v22, %v242_v23 }
  0xbd   :  { %v184_v41 = vadd.f32 %v176_v32, %v132_v35 }
  0xbe   :  { %v158_v27 = vpop.permute.xlu1 %157  ;;  %471 = vmatprep.subr.bf16.mxu0 %v257_v26  ;;  %486 = vmatprep.subr.bf16.mxu1 %v257_v26  ;;  %v412_v44 = vpop.permute.xlu0 %411 }
  0xbf   :  { %472 = vmatpush3.bf16.msra.mxu0 %v257_v26  ;;  %490 = vmatpush3.bf16.msra.mxu1 %v257_v26  ;;  %v177_v37 = vmul.f32 %v652_v48, %v158_v27 }
  0xc1   :  { %v185_v47 = vadd.f32 %v177_v37, %v133_v39 }
  0xc3   :  { %v70_v25 = vpop.permute.xlu1 %69 }
  0xc4   :  { %v83_v52 = vmul.f32 %v644_v40, %v70_v25 }
  0xc6   :  { %v135_v60 = vadd.f32 %v127_v51, %v83_v52 }
  0xc8   :  { %v110_v28 = vpop.permute.xlu1 %109 }
  0xc9   :  { %v126_v53 = vmul.f32 %v646_v43, %v110_v28 }
  0xcb   :  { %v134_v62 = vadd.f32 %v126_v53, %v82_v56 }
  0xcd   :  { %v206_v33 = vpop.permute.xlu1 %205  ;;  %v186_v2 = vadd.f32 %v178_v63, %v134_v62 }
  0xce   :  { %v228_v38 = vmul.f32 %v649_v46, %v206_v33 }
  0xd0   :  { %v236_v42 = vadd.f32 %v228_v38, %v184_v41 }
  0xd1   :  { %v210_v45 = vpop.permute.xlu1 %209 }
  0xd2   :  { %v229_v50 = vmul.f32 %v649_v46, %v210_v45  ;;  %v244_v57 = vmax.f32 %v236_v42, 0.0 }
  0xd4   :  { %v237_v54 = vadd.f32 %v229_v50, %v185_v47 }
  0xd6   :  { %v245_v58 = vmax.f32 %v237_v54, 0.0  ;;  %v166_v59 = vpop.permute.xlu1 %165 }
  0xd7   :  { %v179_v61 = vmul.f32 %v652_v48, %v166_v59  ;;  %v522_v48 = vld [vmem:[%s713_s2 + $0x8] sm:$0xff]  }
  0xd8   :  { %v258_v0 = vpack.c.bf16 %v245_v58, %v244_v57  ;;  %v436_v57 = vstv %s715_s4 }
  0xd9   :  { %v187_v1 = vadd.f32 %v179_v61, %v135_v60 }
  0xda   :  { %473 = vmatprep.subr.bf16.mxu0 %v258_v0  ;;  %487 = vmatprep.subr.bf16.mxu1 %v258_v0 }
  0xdb   :  { %v214_v43 = vpop.permute.xlu1 %213  ;;  %474 = vmatpush3.bf16.msra.mxu0 %v258_v0  ;;  %491 = vmatpush3.bf16.msra.mxu1 %v258_v0  ;;  %v239_v34 = vadd.f32 %v231_v49, %v187_v1 }
  0xdc   :  { %v230_v40 = vmul.f32 %v649_v46, %v214_v43 }
  0xdd   :  { %v247_v4 = vmax.f32 %v239_v34, 0.0 }
  0xde   :  { %v238_v3 = vadd.f32 %v230_v40, %v186_v2 }
  0xe0   :  { %v246_v5 = vmax.f32 %v238_v3, 0.0  ;;  %v377_v46 = vpop.permute.xlu1 %376 }
  0xe2   :  { %v259_v6 = vpack.c.bf16 %v247_v4, %v246_v5 }
  0xe4   :  { %475 = vmatprep.subr.bf16.mxu0 %v259_v6  ;;  %488 = vmatprep.subr.bf16.mxu1 %v259_v6  ;;  %v382_v8 = vpop.permute.xlu1 %381 }
  0xe5   :  { %476 = vmatpush3.bf16.msra.mxu0 %v259_v6  ;;  %492 = vmatpush3.bf16.msra.mxu1 %v259_v6 }
  0xe8   :  { %478 = vmatmul.mubr.msk.bf16.vlgmr.msra.gmra.mrb[0].mxu0 %vm280_vm0, %v522_v48  ;;  %482 = vmatmul.mubr.msk.bf16.vlgmr.msra.gmra.mrb[0].mxu1 %vm280_vm0, %v523_v7  ;;  %v392_v9 = vpop.permute.xlu1 %391 }
  0xec   :  { %v397_v28 = vpop.permute.xlu1 %396 }
  0xf0   :  { %v407_v41 = vpop.permute.xlu1 %406 }
 0x1bb   :  { %v479_v11 = vpop.f32.mrb[0].mxu0  ;;  %v483_v12 = vpop.f32.mrb[0].mxu1 }
 0x1bc   :  { %v327_v13 = vpop.f32.mrb[1].mxu0  ;;  %v343_v14 = vpop.f32.mrb[1].mxu1  ;;  %v360_v20 = vmax.f32 %v479_v11, 0.0  ;;  %v364_v33 = vmax.f32 %v483_v12, 0.0 }
 0x1bd   :  { %v358_v15 = vmax.f32 %v327_v13, 0.0  ;;  %v480_v16 = vpop.f32.mrb[2].mxu0  ;;  %v484_v17 = vpop.f32.mrb[2].mxu1  ;;  %v362_v27 = vmax.f32 %v343_v14, 0.0 }
 0x1be   :  { %v330_v18 = vpop.f32.mrb[3].mxu0  ;;  %v346_v19 = vpop.f32.mrb[3].mxu1  ;;  %v361_v23 = vmax.f32 %v480_v16, 0.0  ;;  %v416_v26 = vmul.f32 %v387_v10, %v360_v20  ;;  %v365_v37 = vmax.f32 %v484_v17, 0.0  ;;  %v420_v45 = vmul.f32 %v407_v41, %v364_v33 }
 0x1bf   :  { %v359_v21 = vmax.f32 %v330_v18, 0.0  ;;  %v414_v22 = vmul.f32 %v377_v46, %v358_v15  ;;  %v363_v32 = vmax.f32 %v346_v19, 0.0  ;;  %v418_v35 = vmul.f32 %v397_v28, %v362_v27 }
 0x1c0   :  { %v417_v30 = vmul.f32 %v392_v9, %v361_v23  ;;  %v421_v42 = vmul.f32 %v412_v44, %v365_v37 }
 0x1c1   :  { %v415_v24 = vmul.f32 %v382_v8, %v359_v21  ;;  %v419_v38 = vmul.f32 %v402_v29, %v363_v32 }
 0x1c3   :  { %v422_v25 = vadd.f32 %v415_v24, %v414_v22 }
 0x1c5   :  { %v423_v31 = vadd.f32 %v422_v25, %v416_v26 }
 0x1c7   :  { %v424_v36 = vadd.f32 %v423_v31, %v417_v30 }
 0x1c9   :  { %v425_v39 = vadd.f32 %v424_v36, %v418_v35 }
 0x1cb   :  { %v426_v47 = vadd.f32 %v425_v39, %v419_v38 }
 0x1cd   :  { %v427_v50 = vadd.f32 %v426_v47, %v420_v45 }
 0x1cf   :  { %v428_v51 = vadd.f32 %v427_v50, %v421_v42 }
 0x1d1   :  { %v429_v52 = vrot.slane %v428_v51, 4 }
 0x1d3   :  { %v430_v53 = vadd.f32 %v429_v52, %v428_v51 }
 0x1d5   :  { %v431_v54 = vrot.slane %v430_v53, 2 }
 0x1d7   :  { %v432_v55 = vadd.f32 %v431_v54, %v430_v53 }
 0x1d9   :  { %v433_v56 = vrot.slane %v432_v55, 1 }
 0x1db   :  { %v434_v58 = vadd.f32 %v433_v56, %v432_v55 }
 0x1dd   :  { %v437_v59 = vadd.f32 %v436_v57, %v434_v58 }
 0x1df   :  { %438 = vst [vmem:[#allocation3] sm:$0x1] %v437_v59 }
 0x1e0   :  { %535 = shalt.err (!%p532_p4)
}
 0x1e1   :  { %s536_s13 = scalar_lea.hbm %s716_s5, 16 }
 0x1e2   :  { %p537_p5 = scmp.ne.s32.totalorder %s716_s5, %s536_s13  ;;  %p540_p6 = scmp.lt.u32.totalorder %s536_s13, %s716_s5 }
 0x1e4   :  { %p542_p7 = pnand %p540_p6, %p537_p5 }
 0x1e6   :  { %545 = shalt.err (!%p542_p7)
}
 0x1e7   :  { %448 = dma.vmem_to_hbm [thread:$0]  %s446_s1, 16, %s716_s5, [#allocation4]  }
 0x1e8   :  { %546 = dma.done.wait [#allocation4], 16  }
 0x1e9   :  { %547 = vsyncadd [#allocation4], 4294967280 }
 0x1ea   :  { %452 = vsyncpa [#allocation4], 1 }

</bundles_post_ra>
